<compile_context>
chip_gen: v6e
topology: v6e:2x2x1
jax: 0.10.0
libtpu: 0.0.40
codegen_flags: <defaults>
</compile_context>

<pallas_src>
from itertools import permutations

import numpy as np
import jax
import jax.numpy as jnp
from jax.experimental import pallas as pl
from jax.experimental.pallas import tpu as pltpu


_LANE = 128          # permutation axis padded to a full lane width (dense vst)
_MAX_T_BLOCK = 2048  # time tile (lanes) per grid step when T is large


def _perm_table(S):
    """Lexicographic permutations (itertools order == PyTorch tie-break order)
    and the one-hot selection tensor W[j, i, p] = 1 iff perm_p[i] == j."""
    perm_list = list(permutations(range(S)))
    P = len(perm_list)
    P_pad = max(_LANE, ((P + _LANE - 1) // _LANE) * _LANE)
    W = np.zeros((S, S, P_pad), np.float32)
    for p_idx, perm in enumerate(perm_list):
        for i, j in enumerate(perm):
            W[j, i, p_idx] = 1.0
    return perm_list, P, P_pad, W


def _make_pit_kernel(S, inv_st):
    """Kernel body.  Block shapes:
         w_ref    : [S, S, P_pad]      constant selection tables
         pred_ref : [BLK_B, S, T_BLK]
         targ_ref : [BLK_B, S, T_BLK]
         out_ref  : [1, BLK_B, P_pad]  per-permutation losses (f32, lane-dense)
       Grid: (batch_blocks, time_blocks); time is a reduction axis accumulated
       directly into the resident output block (init via pl.when)."""

    def kernel(w_ref, pred_ref, targ_ref, out_ref):
        @pl.when(pl.program_id(1) == 0)
        def _init():
            out_ref[...] = jnp.zeros_like(out_ref)

        pred = pred_ref[...].astype(jnp.float32)    # [BLK_B, S, T]
        targ = targ_ref[...].astype(jnp.float32)    # [BLK_B, S, T]
        blk_b = pred.shape[0]
        p_pad = out_ref.shape[-1]

        acc = jnp.zeros((blk_b, p_pad), jnp.float32)
        for j in range(S):                          # static unroll, S is tiny
            # prediction source j vs. every target source i — direct squared
            # error (exact for the loss~0 case, no cancellation).
            pj = pred[:, j:j + 1, :]                # [BLK_B, 1, T] sublane bcast
            d = targ - pj                           # [BLK_B, S, T]
            sq = jnp.sum(d * d, axis=-1)            # [BLK_B, S]
            # scatter into per-permutation scores: W[j][i, p] == 1 iff
            # permutation p assigns prediction j to target i.  (MXU matmul with
            # a lane-dense 128-wide output.)
            acc = acc + jax.lax.dot_general(
                sq, w_ref[j],
                dimension_numbers=(((1,), (0,)), ((), ())),
                preferred_element_type=jnp.float32)

        out_ref[...] += (acc * inv_st)[None, :, :]

    return kernel


def _choose_block_b(B):
    if B <= 3:
        return max(1, B)
    # >= 2 grid steps (keeps both v7x TensorCores busy) and <= 16 batch items
    # per step (plenty to amortise per-step overhead at these tile sizes).
    return max(1, min(16, B // 2))


def _pit_perm_losses(preds_bst, targets_bst):
    """preds_bst, targets_bst: [B, S, T] -> (loss [B], best_perm_index [B])."""
    B, S, T = preds_bst.shape
    _, P, P_pad, W_np = _perm_table(S)
    W = jnp.asarray(W_np)

    blk_b = _choose_block_b(B)
    nb = -(-B // blk_b)
    B_pad = nb * blk_b

    if T <= _MAX_T_BLOCK:
        t_blk, T_pad = T, T
    else:
        t_blk = _MAX_T_BLOCK                       # multiple of 128
        T_pad = -(-T // t_blk) * t_blk
    nt = T_pad // t_blk

    pp, tt = preds_bst, targets_bst
    if B_pad != B or T_pad != T:
        # zero padding is harmless: (0-0)^2 adds nothing to the time sum and the
        # padded batch rows / permutation lanes are sliced away below.
        pad = ((0, B_pad - B), (0, 0), (0, T_pad - T))
        pp = jnp.pad(pp, pad)
        tt = jnp.pad(tt, pad)

    inv_st = 1.0 / float(S * T)                    # true (unpadded) T
    kernel = _make_pit_kernel(S, inv_st)

    out = pl.pallas_call(
        kernel,
        out_shape=jax.ShapeDtypeStruct((nb, blk_b, P_pad), jnp.float32),
        grid_spec=pltpu.PrefetchScalarGridSpec(
            num_scalar_prefetch=0,
            grid=(nb, nt),
            in_specs=[
                pl.BlockSpec((S, S, P_pad), lambda b, t: (0, 0, 0)),
                pl.BlockSpec((blk_b, S, t_blk), lambda b, t: (b, 0, t)),
                pl.BlockSpec((blk_b, S, t_blk), lambda b, t: (b, 0, t)),
            ],
            out_specs=pl.BlockSpec((1, blk_b, P_pad), lambda b, t: (b, 0, 0)),
        ),
        compiler_params=pltpu.CompilerParams(
            dimension_semantics=("parallel", "arbitrary"),
            # small footprint; well inside v7x's 64 MiB physical VMEM.
            vmem_limit_bytes=32 * 1024 * 1024,
        ),
    )(W, pp, tt)

    perm_losses = out.reshape(B_pad, P_pad)[:B, :P]        # [B, P]
    loss = jnp.min(perm_losses, axis=-1)
    best = jnp.argmin(perm_losses, axis=-1)                # first-min tie-break
    return loss, best


@jax.jit
def _pit_forward(preds, targets):
    """preds/targets: [B, ..., S] (any middle dims) -> (loss [B], best_idx [B])."""
    B, S = preds.shape[0], preds.shape[-1]
    pb = jnp.moveaxis(preds.reshape(B, -1, S), -1, 1)      # [B, S, T]
    tb = jnp.moveaxis(targets.reshape(B, -1, S), -1, 1)    # [B, S, T]
    return _pit_perm_losses(pb, tb)


class PitWrapperMSE:
    """JAX/Pallas equivalent of PitWrapper(nn.MSELoss(reduction="none")).

    forward(preds, targets) -> (loss [batch], perms list-of-tuples), matching
    the PyTorch module's API (shapes [batch, ..., sources])."""

    def __call__(self, preds, targets):
        return self.forward(preds, targets)

    def forward_device(self, preds, targets):
        """Device-only variant: (loss [B], best_perm_index [B]) with no host
        sync — use inside jitted training steps."""
        preds = jnp.asarray(preds)                 # keep bf16/f32 as given
        targets = jnp.asarray(targets)
        return _pit_forward(preds, targets)

    def forward(self, preds, targets):
        preds = jnp.asarray(preds)
        targets = jnp.asarray(targets)
        S = preds.shape[-1]
        loss, best = self.forward_device(preds, targets)
        perm_list = list(permutations(range(S)))
        # Host sync is required only because (like the PyTorch module) we
        # return python tuples for the optimal permutations.
        best_host = np.asarray(jax.device_get(best))
        perms = [perm_list[int(k)] for k in best_host]
        return loss, perms

    @staticmethod
    def reorder_tensor(tensor, p):
        tensor = jnp.asarray(tensor)
        idx = jnp.asarray(np.asarray(p, dtype=np.int32))   # [B, S]
        idx = idx.reshape(idx.shape[0], *([1] * (tensor.ndim - 2)), idx.shape[1])
        return jnp.take_along_axis(tensor, idx, axis=-1)


def _reference_scores(preds, targets):
    """Pure-jnp reference: per-permutation MSE scores [B, P] (no Pallas)."""
    B, T, S = preds.shape
    diff = preds[:, :, None, :] - targets[:, :, :, None]   # [B, T, i, j]
    loss_mat = jnp.mean(diff * diff, axis=1)               # [B, S, S]
    rows = jnp.arange(S)
    return jnp.stack(
        [jnp.mean(loss_mat[:, rows, jnp.asarray(p)], axis=-1)
         for p in permutations(range(S))], axis=-1)        # [B, P]


if __name__ == "__main__":
    pit = PitWrapperMSE()

    # ---- test 1: docstring shapes (2, 32, 4), random preds vs. targets ----
    key = jax.random.PRNGKey(0)
    k1, k2 = jax.random.split(key)
    B, T, S = 2, 32, 4
    targets = jax.random.uniform(k1, (B, T, S), dtype=jnp.float32)
    preds = jax.random.uniform(k2, (B, T, S), dtype=jnp.float32)

    loss, perms = pit(preds, targets)
    loss = jax.block_until_ready(loss)
    assert loss.shape == (B,) and len(perms) == B and all(len(p) == S for p in perms)

    ref_scores = np.asarray(_reference_scores(preds, targets))
    ref_min = ref_scores.min(axis=-1)
    np.testing.assert_allclose(np.asarray(loss), ref_min, rtol=1e-4, atol=1e-5)
    perm_list = list(permutations(range(S)))
    for b in range(B):  # returned permutation must achieve the minimum
        k = perm_list.index(perms[b])
        assert ref_scores[b, k] <= ref_min[b] + 1e-5

    # ---- test 2: permuted-targets case from the docstring -> loss == 0 ----
    p = (3, 0, 2, 1)
    preds_perm = targets[..., jnp.asarray(p)]
    loss0, perms0 = pit(preds_perm, targets)
    loss0 = jax.block_until_ready(loss0)
    assert float(jnp.max(jnp.abs(loss0))) < 1e-6
    assert all(q == (1, 3, 2, 0) for q in perms0)   # inverse permutation of p

    # ---- test 3: bigger batch + long sequence (exercises batch blocking, the
    #      T reduction grid axis and zero padding of the last T tile) ----
    k3, k4 = jax.random.split(k2)
    B2, T2 = 6, 2304            # 2304 > 2048 -> two time tiles, padded to 4096
    targets2 = jax.random.uniform(k3, (B2, T2, S), dtype=jnp.float32)
    preds2 = jax.random.uniform(k4, (B2, T2, S), dtype=jnp.float32)
    loss2, _ = pit(preds2, targets2)
    loss2 = jax.block_until_ready(loss2)
    ref2 = np.asarray(_reference_scores(preds2, targets2)).min(axis=-1)
    np.testing.assert_allclose(np.asarray(loss2), ref2, rtol=1e-4, atol=1e-5)

    print("KERNEL_OK")
</pallas_src>

<mosaic_0001>
module attributes {stable_mosaic.version = 11 : i64} {
  func.func @kernel(%arg0: i32, %arg1: i32, %arg2: memref<4x4x128xf32, #tpu.memory_space<vmem>>, %arg3: memref<2x4x32xf32, #tpu.memory_space<vmem>>, %arg4: memref<2x4x32xf32, #tpu.memory_space<vmem>>, %arg5: memref<1x2x128xf32, #tpu.memory_space<vmem>>) attributes {dimension_semantics = [#tpu.dimension_semantics<parallel>, #tpu.dimension_semantics<arbitrary>], iteration_bounds = array<i64: 1, 1>, scalar_prefetch = 0 : i64, scratch_operands = 0 : i64, tpu.core_type = #tpu.core_type<tc>, window_params = [{pipeline_mode = #tpu.pipeline_mode<synchronous>, transform_indices = @transform_0, window_bounds = array<i64: 4, 4, 128>}, {transform_indices = @transform_1, window_bounds = array<i64: 2, 4, 32>}, {transform_indices = @transform_2, window_bounds = array<i64: 2, 4, 32>}, {transform_indices = @transform_3, window_bounds = array<i64: 1, 2, 128>}]} {
    %c0_i32 = arith.constant 0 : i32
    %0 = arith.cmpi eq, %arg1, %c0_i32 : i32
    %1 = arith.extui %0 : i1 to i32
    %c0_i32_0 = arith.constant 0 : i32
    %2 = arith.cmpi ne, %1, %c0_i32_0 : i32
    scf.if %2 {
      %cst_30 = arith.constant 0.000000e+00 : f32
      %48 = vector.broadcast %cst_30 : f32 to vector<1x2x128xf32>
      %c0_31 = arith.constant 0 : index
      %c0_32 = arith.constant 0 : index
      %c0_33 = arith.constant 0 : index
      %49 = vector.load %arg5[%c0_31, %c0_32, %c0_33] : memref<1x2x128xf32, #tpu.memory_space<vmem>>, vector<1x2x128xf32>
      tpu.vector_store %arg5[%c0_31, %c0_32, %c0_33], %48 {strides = array<i32>} : memref<1x2x128xf32, #tpu.memory_space<vmem>>, vector<1x2x128xf32>,
    } else {
    }
    %c0 = arith.constant 0 : index
    %c0_1 = arith.constant 0 : index
    %c0_2 = arith.constant 0 : index
    %3 = vector.load %arg3[%c0, %c0_1, %c0_2] : memref<2x4x32xf32, #tpu.memory_space<vmem>>, vector<2x4x32xf32>
    %c0_3 = arith.constant 0 : index
    %c0_4 = arith.constant 0 : index
    %c0_5 = arith.constant 0 : index
    %4 = vector.load %arg4[%c0_3, %c0_4, %c0_5] : memref<2x4x32xf32, #tpu.memory_space<vmem>>, vector<2x4x32xf32>
    %cst = arith.constant 0.000000e+00 : f32
    %5 = vector.broadcast %cst : f32 to vector<2x128xf32>
    %6 = vector.extract_strided_slice %3 {offsets = [0, 0, 0], sizes = [2, 1, 32], strides = [1, 1, 1]} : vector<2x4x32xf32> to vector<2x1x32xf32>
    %7 = vector.broadcast %6 : vector<2x1x32xf32> to vector<2x4x32xf32>
    %8 = arith.subf %4, %7 : vector<2x4x32xf32>
    %9 = arith.mulf %8, %8 : vector<2x4x32xf32>
    %cst_6 = arith.constant dense<0.000000e+00> : vector<2x4xf32>
    %10 = vector.multi_reduction <add>, %9, %cst_6 [2] : vector<2x4x32xf32> to vector<2x4xf32>
    %c0_7 = arith.constant 0 : index
    %c0_8 = arith.constant 0 : index
    %c0_9 = arith.constant 0 : index
    %11 = vector.load %arg2[%c0_7, %c0_8, %c0_9] : memref<4x4x128xf32, #tpu.memory_space<vmem>>, vector<1x4x128xf32>
    %12 = vector.shape_cast %11 : vector<1x4x128xf32> to vector<4x128xf32>
    %cst_10 = arith.constant dense<0.000000e+00> : vector<2x128xf32>
    %13 = tpu.matmul %10, %12, %cst_10 {dimension_numbers = #tpu.dot_dimension_numbers<[1], [0], [0], [1], [0, 0, 1, 1], [], []>} : vector<2x4xf32>, vector<4x128xf32>, vector<2x128xf32> -> vector<2x128xf32>
    %14 = arith.addf %5, %13 : vector<2x128xf32>
    %15 = vector.extract_strided_slice %3 {offsets = [0, 1, 0], sizes = [2, 1, 32], strides = [1, 1, 1]} : vector<2x4x32xf32> to vector<2x1x32xf32>
    %16 = vector.broadcast %15 : vector<2x1x32xf32> to vector<2x4x32xf32>
    %17 = arith.subf %4, %16 : vector<2x4x32xf32>
    %18 = arith.mulf %17, %17 : vector<2x4x32xf32>
    %cst_11 = arith.constant dense<0.000000e+00> : vector<2x4xf32>
    %19 = vector.multi_reduction <add>, %18, %cst_11 [2] : vector<2x4x32xf32> to vector<2x4xf32>
    %c1 = arith.constant 1 : index
    %c0_12 = arith.constant 0 : index
    %c0_13 = arith.constant 0 : index
    %20 = vector.load %arg2[%c1, %c0_12, %c0_13] : memref<4x4x128xf32, #tpu.memory_space<vmem>>, vector<1x4x128xf32>
    %21 = vector.shape_cast %20 : vector<1x4x128xf32> to vector<4x128xf32>
    %cst_14 = arith.constant dense<0.000000e+00> : vector<2x128xf32>
    %22 = tpu.matmul %19, %21, %cst_14 {dimension_numbers = #tpu.dot_dimension_numbers<[1], [0], [0], [1], [0, 0, 1, 1], [], []>} : vector<2x4xf32>, vector<4x128xf32>, vector<2x128xf32> -> vector<2x128xf32>
    %23 = arith.addf %14, %22 : vector<2x128xf32>
    %24 = vector.extract_strided_slice %3 {offsets = [0, 2, 0], sizes = [2, 1, 32], strides = [1, 1, 1]} : vector<2x4x32xf32> to vector<2x1x32xf32>
    %25 = vector.broadcast %24 : vector<2x1x32xf32> to vector<2x4x32xf32>
    %26 = arith.subf %4, %25 : vector<2x4x32xf32>
    %27 = arith.mulf %26, %26 : vector<2x4x32xf32>
    %cst_15 = arith.constant dense<0.000000e+00> : vector<2x4xf32>
    %28 = vector.multi_reduction <add>, %27, %cst_15 [2] : vector<2x4x32xf32> to vector<2x4xf32>
    %c2 = arith.constant 2 : index
    %c0_16 = arith.constant 0 : index
    %c0_17 = arith.constant 0 : index
    %29 = vector.load %arg2[%c2, %c0_16, %c0_17] : memref<4x4x128xf32, #tpu.memory_space<vmem>>, vector<1x4x128xf32>
    %30 = vector.shape_cast %29 : vector<1x4x128xf32> to vector<4x128xf32>
    %cst_18 = arith.constant dense<0.000000e+00> : vector<2x128xf32>
    %31 = tpu.matmul %28, %30, %cst_18 {dimension_numbers = #tpu.dot_dimension_numbers<[1], [0], [0], [1], [0, 0, 1, 1], [], []>} : vector<2x4xf32>, vector<4x128xf32>, vector<2x128xf32> -> vector<2x128xf32>
    %32 = arith.addf %23, %31 : vector<2x128xf32>
    %33 = vector.extract_strided_slice %3 {offsets = [0, 3, 0], sizes = [2, 1, 32], strides = [1, 1, 1]} : vector<2x4x32xf32> to vector<2x1x32xf32>
    %34 = vector.broadcast %33 : vector<2x1x32xf32> to vector<2x4x32xf32>
    %35 = arith.subf %4, %34 : vector<2x4x32xf32>
    %36 = arith.mulf %35, %35 : vector<2x4x32xf32>
    %cst_19 = arith.constant dense<0.000000e+00> : vector<2x4xf32>
    %37 = vector.multi_reduction <add>, %36, %cst_19 [2] : vector<2x4x32xf32> to vector<2x4xf32>
    %c3 = arith.constant 3 : index
    %c0_20 = arith.constant 0 : index
    %c0_21 = arith.constant 0 : index
    %38 = vector.load %arg2[%c3, %c0_20, %c0_21] : memref<4x4x128xf32, #tpu.memory_space<vmem>>, vector<1x4x128xf32>
    %39 = vector.shape_cast %38 : vector<1x4x128xf32> to vector<4x128xf32>
    %cst_22 = arith.constant dense<0.000000e+00> : vector<2x128xf32>
    %40 = tpu.matmul %37, %39, %cst_22 {dimension_numbers = #tpu.dot_dimension_numbers<[1], [0], [0], [1], [0, 0, 1, 1], [], []>} : vector<2x4xf32>, vector<4x128xf32>, vector<2x128xf32> -> vector<2x128xf32>
    %41 = arith.addf %32, %40 : vector<2x128xf32>
    %c0_23 = arith.constant 0 : index
    %c0_24 = arith.constant 0 : index
    %c0_25 = arith.constant 0 : index
    %42 = vector.load %arg5[%c0_23, %c0_24, %c0_25] : memref<1x2x128xf32, #tpu.memory_space<vmem>>, vector<1x2x128xf32>
    %cst_26 = arith.constant 7.812500e-03 : f32
    %43 = vector.broadcast %cst_26 : f32 to vector<2x128xf32>
    %44 = arith.mulf %41, %43 : vector<2x128xf32>
    %45 = vector.shape_cast %44 : vector<2x128xf32> to vector<1x2x128xf32>
    %46 = arith.addf %42, %45 : vector<1x2x128xf32>
    %c0_27 = arith.constant 0 : index
    %c0_28 = arith.constant 0 : index
    %c0_29 = arith.constant 0 : index
    %47 = vector.load %arg5[%c0_27, %c0_28, %c0_29] : memref<1x2x128xf32, #tpu.memory_space<vmem>>, vector<1x2x128xf32>
    tpu.vector_store %arg5[%c0_27, %c0_28, %c0_29], %46 {strides = array<i32>} : memref<1x2x128xf32, #tpu.memory_space<vmem>>, vector<1x2x128xf32>,
    return
  }
  func.func @transform_0(%arg0: i32, %arg1: i32) -> (i32, i32, i32) {
    %c0_i32 = arith.constant 0 : i32
    %c0_i32_0 = arith.constant 0 : i32
    %c0_i32_1 = arith.constant 0 : i32
    %c0_i32_2 = arith.constant 0 : i32
    return %c0_i32, %c0_i32_0, %c0_i32_1 : i32, i32, i32
  }
  func.func @transform_1(%arg0: i32, %arg1: i32) -> (i32, i32, i32) {
    %c0_i32 = arith.constant 0 : i32
    %c0_i32_0 = arith.constant 0 : i32
    return %arg0, %c0_i32, %arg1 : i32, i32, i32
  }
  func.func @transform_2(%arg0: i32, %arg1: i32) -> (i32, i32, i32) {
    %c0_i32 = arith.constant 0 : i32
    %c0_i32_0 = arith.constant 0 : i32
    return %arg0, %c0_i32, %arg1 : i32, i32, i32
  }
  func.func @transform_3(%arg0: i32, %arg1: i32) -> (i32, i32, i32) {
    %c0_i32 = arith.constant 0 : i32
    %c0_i32_0 = arith.constant 0 : i32
    %c0_i32_1 = arith.constant 0 : i32
    return %arg0, %c0_i32, %c0_i32_0 : i32, i32, i32
  }
}

</mosaic_0001>

<bundles_post_ra>
// kernel: _pit_forward.1
= control target key start
LH: loop header
LB: loop body
LE: loop exit
PB: predicated region body
PF: predicated region fallthrough
CT: control target
= control target key end

     0   :  { %8 = vsyncpa [#allocation3], 0  ;;  %s691_s0 = inlined_call_operand.hbm [shape: f32[4,4,128], index: 0, kind: input, shape index: {}]   ;;  %s692_s1 = inlined_call_operand.hbm [shape: f32[2,4,32], index: 1, kind: input, shape index: {}]   ;;  %s693_s2 = inlined_call_operand.hbm [shape: f32[2,4,32], index: 2, kind: input, shape index: {}]   ;;  %s694_s3 = inlined_call_operand.vmem [shape: f32[1,2,128], index: 3, kind: output, shape index: {}]  }
   0x1   :  { %9 = vsyncpa [#allocation5], 0  ;;  %s612_s12 = smov [#allocation4]   ;;  %s613_s14 = smov [#allocation2]  }
   0x2   :  { %s27_s13 = sshll.u32 %s612_s12, 4  ;;  %s15_s15 = sshll.u32 %s613_s14, 4  ;;  %s28_s13 = int_to_ptr.vmem [resolvable:$true] %s27_s13  ;;  %s16_s15 = int_to_ptr.vmem [resolvable:$true] %s15_s15 }
   0x3   :  { %s556_s16 = scalar_lea.vmem %s28_s13, 128  ;;  %p561_p1 = scmp.lt.s32.totalorder %s28_s13, %s28_s13 }
   0x4   :  { %p557_p0 = scmp.ne.s32.totalorder %s28_s13, %s556_s16  ;;  %p562_p2 = scmp.lt.s32.totalorder %s556_s16, %s556_s16 }
   0x6   :  { %p563_p3 = por %p562_p2, %p561_p1 }
   0x8   :  { %p564_p4 = pnand %p563_p3, %p557_p0 }
   0xa   :  { %567 = shalt.err (!%p564_p4)
}
   0xb   :  { %s614_s17 = smov 64   ;;  %s615_s18 = smov 4  }
   0xc   :  { %33 = dma.hbm_to_vmem [thread:$0]  %s692_s1, 128, %s28_s13, [#allocation5], %s614_s17, %s614_s17, %s615_s18  }
   0xd   :  { %s576_s21 = scalar_lea.vmem %s16_s15, 256  ;;  %p581_p6 = scmp.lt.s32.totalorder %s16_s15, %s16_s15 }
   0xe   :  { %p577_p5 = scmp.ne.s32.totalorder %s16_s15, %s576_s21  ;;  %p582_p7 = scmp.lt.s32.totalorder %s576_s21, %s576_s21 }
  0x10   :  { %p583_p8 = por %p582_p7, %p581_p6 }
  0x12   :  { %p584_p9 = pnand %p583_p8, %p577_p5 }
  0x14   :  { %587 = shalt.err (!%p584_p9)
}
  0x15   :  { %21 = dma.hbm_to_vmem [thread:$0]  %s691_s0, 256, %s16_s15, [#allocation3], %s614_s17, %s614_s17, %s615_s18  }
  0x16   :  { %s616_s24 = smov [#allocation6]  }
  0x17   :  { %s39_s25 = sshll.u32 %s616_s24, 4  ;;  %s40_s25 = int_to_ptr.vmem [resolvable:$true] %s39_s25 }
  0x18   :  { %s596_s26 = scalar_lea.vmem %s40_s25, 128  ;;  %p601_p11 = scmp.lt.s32.totalorder %s40_s25, %s40_s25 }
  0x19   :  { %p597_p10 = scmp.ne.s32.totalorder %s40_s25, %s596_s26  ;;  %p602_p12 = scmp.lt.s32.totalorder %s596_s26, %s596_s26 }
  0x1b   :  { %p603_p13 = por %p602_p12, %p601_p11 }
  0x1d   :  { %p604_p0 = pnand %p603_p13, %p597_p10 }
  0x1f   :  { %607 = shalt.err (!%p604_p0)
}
  0x20   :  { %45 = dma.hbm_to_vmem [thread:$0]  %s693_s2, 128, %s40_s25, [#allocation5], %s614_s17, %s614_s17, %s615_s18  }
  0x21   :  { %608 = dma.done.wait [#allocation3], 256  }
  0x22   :  { %609 = vsyncadd [#allocation3], 4294967040 }
  0x23   :  { %610 = dma.done.wait [#allocation5], 256  }
  0x24   :  { %611 = vsyncadd [#allocation5], 4294967040  ;;  %v64_v0 = vlaneseq  ;;  %v60_v8 = vld [vmem:[#allocation4] sm:$0xf]  ;;  %v62_v9 = vld [vmem:[#allocation6] sm:$0xf] }
  0x25   :  { %v61_v10 = vld [vmem:[#allocation4 + $0x4] sm:$0xf]  ;;  %v63_v13 = vld [vmem:[#allocation6 + $0x4] sm:$0xf]  ;;  %vm76_vm0 = vcmask 257024   ;;  %vm121_vm1 = vcmask 1043456  }
  0x26   :  { %v65_v1 = vshrl.u32 %v64_v0, 7  ;;  %v107_v2 = vand.u32 127, %v64_v0  ;;  %v103_v44 = vld [vmem:[#allocation2 + $0x4] sm:$0xf]  ;;  %v617_v45 = vmov 0.0   ;;  %vm618_vm2 = vmmov 0  }
  0x27   :  { %521 = vmatprep.subr.mxu0 %v617_v45  ;;  %59 = vst [vmem:[%s694_s3] sm:$0x3] %v617_v45  ;;  %526 = vmatprep.subr.mxu1 %v617_v45  ;;  %v83_v46 = vld [vmem:[#allocation2] sm:$0xf]  ;;  %vm116_vm3 = vcmask 1041409   ;;  %vm118_vm4 = vcmask 31744  }
  0x28   :  { %v86_v3 = vsub.s32 1, %v65_v1  ;;  %v648_v4 = vsub.s32 %v107_v2, %v65_v1  ;;  %v66_v5 = vsub.s32 0, %v65_v1  ;;  %v283_v6 = vsub.s32 2, %v65_v1  ;;  %522 = vmatpush3.msk.msra.mxu0 %vm121_vm1, %v103_v44  ;;  %523 = vmatprep.mubr.msk.f32.mxu0 %vm618_vm2, %v617_v45  ;;  %v300_v55 = vld [vmem:[#allocation2 + $0x8] sm:$0xf] }
  0x29   :  { %v390_v7 = vsub.s32 3, %v65_v1  ;;  %527 = vmatpush3.msk.msra.mxu1 %vm121_vm1, %v83_v46  ;;  %528 = vmatprep.mubr.msk.f32.mxu1 %vm618_vm2, %v617_v45  ;;  %v407_v58 = vld [vmem:[#allocation2 + $0xc] sm:$0xf] }
  0x2a   :  { %v87_v11 = vrot.slane %v60_v8, %v86_v3  ;;  %v67_v12 = vrot.slane %v60_v8, %v66_v5  ;;  %v91_v14 = vrot.slane %v61_v10, %v86_v3  ;;  %v71_v15 = vrot.slane %v61_v10, %v66_v5  ;;  %531 = vmatprep.subr.mxu0 %v617_v45 }
  0x2b   :  { %v284_v16 = vrot.slane %v60_v8, %v283_v6  ;;  %v288_v17 = vrot.slane %v61_v10, %v283_v6  ;;  %v391_v24 = vrot.slane %v60_v8, %v390_v7  ;;  %v395_v25 = vrot.slane %v61_v10, %v390_v7  ;;  %536 = vmatprep.subr.mxu1 %v617_v45 }
  0x2c   :  { %v92_v18 = vsub.f32 %v62_v9, %v87_v11  ;;  %v72_v19 = vsub.f32 %v62_v9, %v67_v12  ;;  %v93_v20 = vsub.f32 %v63_v13, %v91_v14  ;;  %v73_v21 = vsub.f32 %v63_v13, %v71_v15 }
  0x2d   :  { %v289_v22 = vsub.f32 %v62_v9, %v284_v16  ;;  %v290_v23 = vsub.f32 %v63_v13, %v288_v17  ;;  %v396_v32 = vsub.f32 %v62_v9, %v391_v24  ;;  %v397_v33 = vsub.f32 %v63_v13, %v395_v25 }
  0x2e   :  { %v94_v26 = vmul.f32 %v92_v18, %v92_v18  ;;  %v74_v27 = vmul.f32 %v72_v19, %v72_v19  ;;  %v95_v28 = vmul.f32 %v93_v20, %v93_v20  ;;  %v75_v29 = vmul.f32 %v73_v21, %v73_v21  ;;  %v495_v16 = vld [vmem:[%s694_s3] sm:$0x3] }
  0x2f   :  { %v291_v36 = vmul.f32 %v289_v22, %v289_v22  ;;  %v292_v37 = vmul.f32 %v290_v23, %v290_v23  ;;  %v398_v40 = vmul.f32 %v396_v32, %v396_v32  ;;  %v399_v41 = vmul.f32 %v397_v33, %v397_v33 }
  0x30   :  { %v96_v30 = vsel %vm76_vm0, %v94_v26, 0.0  ;;  %v77_v31 = vsel %vm76_vm0, %v74_v27, 0.0  ;;  %v99_v34 = vsel %vm76_vm0, %v95_v28, 0.0  ;;  %v80_v35 = vsel %vm76_vm0, %v75_v29, 0.0 }
  0x31   :  { %97 = vadd.xlane.f32.xlu0 %v96_v30  ;;  %78 = vadd.xlane.f32.xlu1 %v77_v31  ;;  %v293_v38 = vsel %vm76_vm0, %v291_v36, 0.0  ;;  %v296_v39 = vsel %vm76_vm0, %v292_v37, 0.0  ;;  %v400_v42 = vsel %vm76_vm0, %v398_v40, 0.0  ;;  %v403_v43 = vsel %vm76_vm0, %v399_v41, 0.0 }
  0x35   :  { %100 = vadd.xlane.f32.xlu0 %v99_v34  ;;  %81 = vadd.xlane.f32.xlu1 %v80_v35 }
  0x39   :  { %294 = vadd.xlane.f32.xlu0 %v293_v38  ;;  %297 = vadd.xlane.f32.xlu1 %v296_v39 }
  0x3d   :  { %401 = vadd.xlane.f32.xlu0 %v400_v42  ;;  %404 = vadd.xlane.f32.xlu1 %v403_v43 }
  0xba   :  { %v98_v47 = vpop.xlane.xlu0 %97  ;;  %v79_v48 = vpop.xlane.xlu1 %78 }
  0xbb   :  { %v111_v51 = vrot.slane %v98_v47, %v648_v4  ;;  %v200_v52 = vrot.slane %v79_v48, %v648_v4 }
  0xbe   :  { %v101_v49 = vpop.xlane.xlu0 %100  ;;  %v82_v50 = vpop.xlane.xlu1 %81 }
  0xbf   :  { %v115_v53 = vrot.slane %v101_v49, %v648_v4  ;;  %v204_v54 = vrot.slane %v82_v50, %v648_v4 }
  0xc1   :  { %v117_v56 = vsel %vm116_vm3, %v115_v53, %v111_v51  ;;  %v205_v57 = vsel %vm116_vm3, %v204_v54, %v200_v52 }
  0xc2   :  { %524 = vmatmul.mubr.msk.f32.vlgmr.msra.gmra.mxu0 %vm118_vm4, %v117_v56  ;;  %v295_v59 = vpop.xlane.xlu0 %294  ;;  %529 = vmatmul.mubr.msk.f32.vlgmr.msra.gmra.mxu1 %vm118_vm4, %v205_v57  ;;  %v298_v60 = vpop.xlane.xlu1 %297 }
  0xc3   :  { %v306_v61 = vrot.slane %v295_v59, %v648_v4  ;;  %v310_v62 = vrot.slane %v298_v60, %v648_v4  ;;  %532 = vmatpush3.msk.msra.mxu0 %vm121_vm1, %v300_v55  ;;  %533 = vmatprep.mubr.msk.f32.mxu0 %vm618_vm2, %v617_v45 }
  0xc4   :  { %537 = vmatpush3.msk.msra.mxu1 %vm121_vm1, %v407_v58  ;;  %538 = vmatprep.mubr.msk.f32.mxu1 %vm618_vm2, %v617_v45 }
  0xc5   :  { %v311_v63 = vsel %vm116_vm3, %v310_v62, %v306_v61 }
  0xc6   :  { %v402_v0 = vpop.xlane.xlu0 %401  ;;  %534 = vmatmul.mubr.msk.f32.vlgmr.msra.gmra.mxu0 %vm118_vm4, %v311_v63  ;;  %v405_v1 = vpop.xlane.xlu1 %404 }
  0xc7   :  { %v413_v2 = vrot.slane %v402_v0, %v648_v4  ;;  %v417_v3 = vrot.slane %v405_v1, %v648_v4 }
  0xc9   :  { %v418_v5 = vsel %vm116_vm3, %v417_v3, %v413_v2 }
  0xca   :  { %539 = vmatmul.mubr.msk.f32.vlgmr.msra.gmra.mxu1 %vm118_vm4, %v418_v5 }
 0x182   :  { %v191_v6 = vpop.f32.mrf.mxu0  ;;  %v277_v7 = vpop.f32.mrf.mxu1 }
 0x183   :  { %v278_v11 = vadd.f32 %v277_v7, %v191_v6 }
 0x184   :  { %v525_v8 = vpop.f32.mrf.mxu0  ;;  %v530_v9 = vpop.f32.mrf.mxu1 }
 0x186   :  { %v383_v10 = vpop.f32.mrf.mxu0 }
 0x187   :  { %v387_v13 = vadd.f32 %v383_v10, %v278_v11 }
 0x188   :  { %v535_v12 = vpop.f32.mrf.mxu0 }
 0x18a   :  { %v490_v14 = vpop.f32.mrf.mxu1 }
 0x18b   :  { %v494_v15 = vadd.f32 %v490_v14, %v387_v13 }
 0x18c   :  { %v540_v17 = vpop.f32.mrf.mxu1 }
 0x18d   :  { %v496_v4 = vmul.f32 0.0078125, %v494_v15 }
 0x18f   :  { %v497_v18 = vadd.f32 %v496_v4, %v495_v16 }
 0x191   :  { %498 = vst [vmem:[%s694_s3] sm:$0x3] %v497_v18 }
 0x192   :  { %503 = vsyncpa [#allocation3], 1 }
 0x193   :  { %504 = vsyncpa [#allocation5], 1 }

</bundles_post_ra>
